<compile_context>
chip_gen: v7x
topology: tpu7x:2x2x1
jax: 0.10.0
libtpu: 0.0.40
codegen_flags: <defaults>
</compile_context>

<pallas_src>
import functools

import jax
import jax.numpy as jnp
from jax import lax
from jax.experimental import pallas as pl
from jax.experimental.pallas import tpu as pltpu

EPS = 1e-5


# ---------------------------------------------------------------------------
# Pass 1: conv (3 banded matmuls, bf16 inputs / f32 accum) + per-column stats
# ---------------------------------------------------------------------------
def conv_colstats_kernel(x_ref, wband_ref, out_ref, cs_ref):
    # x_ref:     (1, H+2, (W+2)*Cin)      bf16, zero-padded, lane-fused input slab
    # wband_ref: (3, (W+2)*Cin, W*Cout)   bf16 banded conv weight (one band per dy)
    # out_ref:   (1, H, W*Cout)           f32 conv output slab (lane-dense)
    # cs_ref:    (1, 2, W*Cout)           f32 per-image [column sum; column sum-of-squares]
    H = out_ref.shape[1]

    acc = jnp.zeros(out_ref.shape[1:], jnp.float32)
    for dy in range(3):
        # Slice the Ref directly so only one shifted view is live at a time.
        acc = acc + jnp.dot(
            x_ref[0, dy:dy + H, :], wband_ref[dy],
            preferred_element_type=jnp.float32)

    out_ref[0] = acc

    # Single sweep for BN statistics: per-output-column (lane) sums; the tiny
    # per-channel reduction over W happens in the wrapper.
    col_sum = jnp.sum(acc, axis=0, keepdims=True)        # (1, W*Cout)
    col_sq = jnp.sum(acc * acc, axis=0, keepdims=True)   # (1, W*Cout)
    cs_ref[0] = jnp.concatenate([col_sum, col_sq], axis=0)


# ---------------------------------------------------------------------------
# Pass 2: apply folded BatchNorm: y = conv * scale + shift (lane-dense slabs)
# ---------------------------------------------------------------------------
def bn_apply_kernel(y_ref, scale_ref, shift_ref, o_ref):
    # y_ref: (1, H, W*Cout) f32; scale/shift: (1, W*Cout) f32; o_ref: (1, H, W*Cout)
    o_ref[0] = y_ref[0] * scale_ref[...] + shift_ref[...]


# ---------------------------------------------------------------------------
# Weight prep: 3x3 OIHW weight  ->  banded (3, (W+2)*Cin, W*Cout) matrices
# band[dy][(w+dx)*Cin + ci, w*Cout + co] = weight[co, ci, dy, dx]
# ---------------------------------------------------------------------------
def _build_banded_weight(weight_oihw, W):
    Cout, Cin, KH, KW = weight_oihw.shape
    w_hwio = jnp.transpose(weight_oihw, (2, 3, 1, 0)).astype(jnp.float32)  # (3,3,Cin,Cout)
    bands = []
    for dy in range(KH):
        b = jnp.zeros(((W + 2) * Cin, W * Cout), jnp.float32)
        for dx in range(KW):
            shift = jnp.zeros((W + 2, W), jnp.float32)
            shift = shift.at[jnp.arange(W) + dx, jnp.arange(W)].set(1.0)
            b = b + jnp.einsum("pw,ic->piwc", shift, w_hwio[dy, dx]).reshape(
                (W + 2) * Cin, W * Cout)
        bands.append(b)
    return jnp.stack(bands, axis=0)  # (3, (W+2)*Cin, W*Cout)


# ---------------------------------------------------------------------------
# Wrapper
# ---------------------------------------------------------------------------
def _conv_bn2d_impl(x_nchw, weight_oihw, gamma, beta):
    N, Cin, H, W = x_nchw.shape
    Cout = weight_oihw.shape[0]
    Wp = W + 2
    WC = W * Cout

    # Layout prep: NCHW -> padded, lane-fused (N, H+2, (W+2)*Cin) slab, bf16.
    x_nhwc = jnp.transpose(x_nchw, (0, 2, 3, 1)).astype(jnp.float32)
    x_pad = jnp.pad(x_nhwc, ((0, 0), (1, 1), (1, 1), (0, 0)))
    x_slab = x_pad.reshape(N, H + 2, Wp * Cin).astype(jnp.bfloat16)

    wband = _build_banded_weight(weight_oihw, W).astype(jnp.bfloat16)

    cparams = pltpu.CompilerParams(
        dimension_semantics=("parallel",),
        vmem_limit_bytes=32 * 1024 * 1024,
    )

    # Pass 1: conv + per-column stats.
    conv_out, col_stats = pl.pallas_call(
        conv_colstats_kernel,
        grid=(N,),
        out_shape=(
            jax.ShapeDtypeStruct((N, H, WC), jnp.float32),
            jax.ShapeDtypeStruct((N, 2, WC), jnp.float32),
        ),
        in_specs=[
            pl.BlockSpec((1, H + 2, Wp * Cin), lambda n: (n, 0, 0)),
            pl.BlockSpec((3, Wp * Cin, WC), lambda n: (0, 0, 0)),
        ],
        out_specs=(
            pl.BlockSpec((1, H, WC), lambda n: (n, 0, 0)),
            pl.BlockSpec((1, 2, WC), lambda n: (n, 0, 0)),
        ),
        compiler_params=cparams,
    )(x_slab, wband)

    # Fold BN (batch-stat, biased variance) into per-channel scale/shift. O(Cout) work.
    tot = jnp.sum(col_stats, axis=0)                   # (2, W*Cout)
    tot = tot.reshape(2, W, Cout).sum(axis=1)          # (2, Cout)
    count = float(N * H * W)
    mean = tot[0] / count
    var = jnp.maximum(tot[1] / count - mean * mean, 0.0)   # biased variance (E[x^2]-mean^2)
    scale = gamma.astype(jnp.float32) * lax.rsqrt(var + EPS)
    shift = beta.astype(jnp.float32) - mean * scale
    scale_slab = jnp.tile(scale, W).reshape(1, WC)     # lane m -> channel m % Cout
    shift_slab = jnp.tile(shift, W).reshape(1, WC)

    # Pass 2: normalize (lane-dense scale/shift).
    y_slab = pl.pallas_call(
        bn_apply_kernel,
        grid=(N,),
        out_shape=jax.ShapeDtypeStruct((N, H, WC), jnp.float32),
        in_specs=[
            pl.BlockSpec((1, H, WC), lambda n: (n, 0, 0)),
            pl.BlockSpec((1, WC), lambda n: (0, 0)),
            pl.BlockSpec((1, WC), lambda n: (0, 0)),
        ],
        out_specs=pl.BlockSpec((1, H, WC), lambda n: (n, 0, 0)),
        compiler_params=cparams,
    )(conv_out, scale_slab, shift_slab)

    # Un-fuse lanes and return PyTorch NCHW.
    return jnp.transpose(y_slab.reshape(N, H, W, Cout), (0, 3, 1, 2))


conv_bn2d = jax.jit(_conv_bn2d_impl)


# ---------------------------------------------------------------------------
# Pure-JAX reference with the same numerics contract (bf16 conv inputs, f32 math).
# ---------------------------------------------------------------------------
def conv_bn2d_reference(x_nchw, weight_oihw, gamma, beta):
    xr = x_nchw.astype(jnp.bfloat16).astype(jnp.float32)
    wr = weight_oihw.astype(jnp.bfloat16).astype(jnp.float32)
    y = lax.conv_general_dilated(
        xr, wr, window_strides=(1, 1), padding=((1, 1), (1, 1)),
        dimension_numbers=("NCHW", "OIHW", "NCHW"),
        precision=lax.Precision.HIGHEST)
    mean = jnp.mean(y, axis=(0, 2, 3), keepdims=True)
    var = jnp.mean((y - mean) ** 2, axis=(0, 2, 3), keepdims=True)
    return (y - mean) * lax.rsqrt(var + EPS) * gamma.reshape(1, -1, 1, 1) \
        + beta.reshape(1, -1, 1, 1)


if __name__ == "__main__":
    # ConvBn2d(in_channel=4, out_channel=8) on a small input.
    N, Cin, Cout, H, W = 2, 4, 8, 16, 16

    key = jax.random.PRNGKey(0)
    kx, kw, kg, kb = jax.random.split(key, 4)
    x = jax.random.normal(kx, (N, Cin, H, W), dtype=jnp.float32)
    weight = 0.1 * jax.random.normal(kw, (Cout, Cin, 3, 3), dtype=jnp.float32)  # bias=False
    # Non-trivial BN affine params to exercise the scale/shift path.
    gamma = 1.0 + 0.1 * jax.random.normal(kg, (Cout,), dtype=jnp.float32)
    beta = 0.05 * jax.random.normal(kb, (Cout,), dtype=jnp.float32)

    out = jax.block_until_ready(conv_bn2d(x, weight, gamma, beta))
    ref = jax.block_until_ready(conv_bn2d_reference(x, weight, gamma, beta))

    assert out.shape == (N, Cout, H, W), out.shape
    err = float(jnp.max(jnp.abs(out - ref)))
    assert err < 2e-3, f"max abs err = {err}"

    print("KERNEL_OK")
</pallas_src>

<mosaic_0001>
module attributes {stable_mosaic.version = 11 : i64} {
  func.func @conv_colstats_kernel(%arg0: i32, %arg1: memref<1x18x72xbf16, #tpu.memory_space<vmem>>, %arg2: memref<3x72x128xbf16, #tpu.memory_space<vmem>>, %arg3: memref<1x16x128xf32, #tpu.memory_space<vmem>>, %arg4: memref<1x2x128xf32, #tpu.memory_space<vmem>>) attributes {dimension_semantics = [#tpu.dimension_semantics<parallel>], iteration_bounds = array<i64: 2>, scalar_prefetch = 0 : i64, scratch_operands = 0 : i64, tpu.core_type = #tpu.core_type<tc>, window_params = [{transform_indices = @transform_0, window_bounds = array<i64: 1, 18, 72>}, {pipeline_mode = #tpu.pipeline_mode<synchronous>, transform_indices = @transform_1, window_bounds = array<i64: 3, 72, 128>}, {transform_indices = @transform_2, window_bounds = array<i64: 1, 16, 128>}, {transform_indices = @transform_3, window_bounds = array<i64: 1, 2, 128>}]} {
    %cst = arith.constant 0.000000e+00 : f32
    %0 = vector.broadcast %cst : f32 to vector<16x128xf32>
    %c0 = arith.constant 0 : index
    %c0_0 = arith.constant 0 : index
    %c0_1 = arith.constant 0 : index
    %1 = vector.load %arg1[%c0, %c0_0, %c0_1] : memref<1x18x72xbf16, #tpu.memory_space<vmem>>, vector<1x16x72xbf16>
    %2 = vector.shape_cast %1 : vector<1x16x72xbf16> to vector<16x72xbf16>
    %c0_2 = arith.constant 0 : index
    %c0_3 = arith.constant 0 : index
    %c0_4 = arith.constant 0 : index
    %3 = vector.load %arg2[%c0_2, %c0_3, %c0_4] : memref<3x72x128xbf16, #tpu.memory_space<vmem>>, vector<1x72x128xbf16>
    %4 = vector.shape_cast %3 : vector<1x72x128xbf16> to vector<72x128xbf16>
    %cst_5 = arith.constant dense<0.000000e+00> : vector<16x128xf32>
    %5 = tpu.matmul %2, %4, %cst_5 {dimension_numbers = #tpu.dot_dimension_numbers<[1], [0], [0], [1], [0, 0, 1, 1], [], []>} : vector<16x72xbf16>, vector<72x128xbf16>, vector<16x128xf32> -> vector<16x128xf32>
    %6 = arith.addf %0, %5 : vector<16x128xf32>
    %c0_6 = arith.constant 0 : index
    %c1 = arith.constant 1 : index
    %c0_7 = arith.constant 0 : index
    %7 = vector.load %arg1[%c0_6, %c1, %c0_7] : memref<1x18x72xbf16, #tpu.memory_space<vmem>>, vector<1x16x72xbf16>
    %8 = vector.shape_cast %7 : vector<1x16x72xbf16> to vector<16x72xbf16>
    %c1_8 = arith.constant 1 : index
    %c0_9 = arith.constant 0 : index
    %c0_10 = arith.constant 0 : index
    %9 = vector.load %arg2[%c1_8, %c0_9, %c0_10] : memref<3x72x128xbf16, #tpu.memory_space<vmem>>, vector<1x72x128xbf16>
    %10 = vector.shape_cast %9 : vector<1x72x128xbf16> to vector<72x128xbf16>
    %cst_11 = arith.constant dense<0.000000e+00> : vector<16x128xf32>
    %11 = tpu.matmul %8, %10, %cst_11 {dimension_numbers = #tpu.dot_dimension_numbers<[1], [0], [0], [1], [0, 0, 1, 1], [], []>} : vector<16x72xbf16>, vector<72x128xbf16>, vector<16x128xf32> -> vector<16x128xf32>
    %12 = arith.addf %6, %11 : vector<16x128xf32>
    %c0_12 = arith.constant 0 : index
    %c2 = arith.constant 2 : index
    %c0_13 = arith.constant 0 : index
    %13 = vector.load %arg1[%c0_12, %c2, %c0_13] : memref<1x18x72xbf16, #tpu.memory_space<vmem>>, vector<1x16x72xbf16>
    %14 = vector.shape_cast %13 : vector<1x16x72xbf16> to vector<16x72xbf16>
    %c2_14 = arith.constant 2 : index
    %c0_15 = arith.constant 0 : index
    %c0_16 = arith.constant 0 : index
    %15 = vector.load %arg2[%c2_14, %c0_15, %c0_16] : memref<3x72x128xbf16, #tpu.memory_space<vmem>>, vector<1x72x128xbf16>
    %16 = vector.shape_cast %15 : vector<1x72x128xbf16> to vector<72x128xbf16>
    %cst_17 = arith.constant dense<0.000000e+00> : vector<16x128xf32>
    %17 = tpu.matmul %14, %16, %cst_17 {dimension_numbers = #tpu.dot_dimension_numbers<[1], [0], [0], [1], [0, 0, 1, 1], [], []>} : vector<16x72xbf16>, vector<72x128xbf16>, vector<16x128xf32> -> vector<16x128xf32>
    %18 = arith.addf %12, %17 : vector<16x128xf32>
    %c0_18 = arith.constant 0 : index
    %c0_19 = arith.constant 0 : index
    %c0_20 = arith.constant 0 : index
    %19 = vector.load %arg3[%c0_18, %c0_19, %c0_20] : memref<1x16x128xf32, #tpu.memory_space<vmem>>, vector<1x16x128xf32>
    %20 = vector.shape_cast %19 : vector<1x16x128xf32> to vector<16x128xf32>
    %21 = vector.shape_cast %18 : vector<16x128xf32> to vector<1x16x128xf32>
    tpu.vector_store %arg3[%c0_18, %c0_19, %c0_20], %21 {strides = array<i32>} : memref<1x16x128xf32, #tpu.memory_space<vmem>>, vector<1x16x128xf32>,
    %cst_21 = arith.constant dense<0.000000e+00> : vector<128xf32>
    %22 = vector.multi_reduction <add>, %18, %cst_21 [0] : vector<16x128xf32> to vector<128xf32>
    %23 = vector.shape_cast %22 : vector<128xf32> to vector<1x128xf32>
    %24 = arith.mulf %18, %18 : vector<16x128xf32>
    %cst_22 = arith.constant dense<0.000000e+00> : vector<128xf32>
    %25 = vector.multi_reduction <add>, %24, %cst_22 [0] : vector<16x128xf32> to vector<128xf32>
    %26 = vector.shape_cast %25 : vector<128xf32> to vector<1x128xf32>
    %27 = tpu.concatenate %23, %26 in 0 : vector<1x128xf32>, vector<1x128xf32> -> vector<2x128xf32>
    %c0_23 = arith.constant 0 : index
    %c0_24 = arith.constant 0 : index
    %c0_25 = arith.constant 0 : index
    %28 = vector.load %arg4[%c0_23, %c0_24, %c0_25] : memref<1x2x128xf32, #tpu.memory_space<vmem>>, vector<1x2x128xf32>
    %29 = vector.shape_cast %28 : vector<1x2x128xf32> to vector<2x128xf32>
    %30 = vector.shape_cast %27 : vector<2x128xf32> to vector<1x2x128xf32>
    tpu.vector_store %arg4[%c0_23, %c0_24, %c0_25], %30 {strides = array<i32>} : memref<1x2x128xf32, #tpu.memory_space<vmem>>, vector<1x2x128xf32>,
    return
  }
  func.func @transform_0(%arg0: i32) -> (i32, i32, i32) {
    %c0_i32 = arith.constant 0 : i32
    %c0_i32_0 = arith.constant 0 : i32
    %c0_i32_1 = arith.constant 0 : i32
    return %arg0, %c0_i32, %c0_i32_0 : i32, i32, i32
  }
  func.func @transform_1(%arg0: i32) -> (i32, i32, i32) {
    %c0_i32 = arith.constant 0 : i32
    %c0_i32_0 = arith.constant 0 : i32
    %c0_i32_1 = arith.constant 0 : i32
    %c0_i32_2 = arith.constant 0 : i32
    return %c0_i32, %c0_i32_0, %c0_i32_1 : i32, i32, i32
  }
  func.func @transform_2(%arg0: i32) -> (i32, i32, i32) {
    %c0_i32 = arith.constant 0 : i32
    %c0_i32_0 = arith.constant 0 : i32
    %c0_i32_1 = arith.constant 0 : i32
    return %arg0, %c0_i32, %c0_i32_0 : i32, i32, i32
  }
  func.func @transform_3(%arg0: i32) -> (i32, i32, i32) {
    %c0_i32 = arith.constant 0 : i32
    %c0_i32_0 = arith.constant 0 : i32
    %c0_i32_1 = arith.constant 0 : i32
    return %arg0, %c0_i32, %c0_i32_0 : i32, i32, i32
  }
}

module attributes {stable_mosaic.version = 11 : i64} {
  func.func @bn_apply_kernel(%arg0: i32, %arg1: memref<1x16x128xf32, #tpu.memory_space<vmem>>, %arg2: memref<1x128xf32, #tpu.memory_space<vmem>>, %arg3: memref<1x128xf32, #tpu.memory_space<vmem>>, %arg4: memref<1x16x128xf32, #tpu.memory_space<vmem>>) attributes {dimension_semantics = [#tpu.dimension_semantics<parallel>], iteration_bounds = array<i64: 2>, scalar_prefetch = 0 : i64, scratch_operands = 0 : i64, tpu.core_type = #tpu.core_type<tc>, window_params = [{transform_indices = @transform_0, window_bounds = array<i64: 1, 16, 128>}, {pipeline_mode = #tpu.pipeline_mode<synchronous>, transform_indices = @transform_1, window_bounds = array<i64: 1, 128>}, {pipeline_mode = #tpu.pipeline_mode<synchronous>, transform_indices = @transform_2, window_bounds = array<i64: 1, 128>}, {transform_indices = @transform_3, window_bounds = array<i64: 1, 16, 128>}]} {
    %c0 = arith.constant 0 : index
    %c0_0 = arith.constant 0 : index
    %c0_1 = arith.constant 0 : index
    %0 = vector.load %arg1[%c0, %c0_0, %c0_1] : memref<1x16x128xf32, #tpu.memory_space<vmem>>, vector<1x16x128xf32>
    %1 = vector.shape_cast %0 : vector<1x16x128xf32> to vector<16x128xf32>
    %c0_2 = arith.constant 0 : index
    %c0_3 = arith.constant 0 : index
    %2 = vector.load %arg2[%c0_2, %c0_3] : memref<1x128xf32, #tpu.memory_space<vmem>>, vector<1x128xf32>
    %3 = vector.broadcast %2 : vector<1x128xf32> to vector<16x128xf32>
    %4 = arith.mulf %1, %3 : vector<16x128xf32>
    %c0_4 = arith.constant 0 : index
    %c0_5 = arith.constant 0 : index
    %5 = vector.load %arg3[%c0_4, %c0_5] : memref<1x128xf32, #tpu.memory_space<vmem>>, vector<1x128xf32>
    %6 = vector.broadcast %5 : vector<1x128xf32> to vector<16x128xf32>
    %7 = arith.addf %4, %6 : vector<16x128xf32>
    %c0_6 = arith.constant 0 : index
    %c0_7 = arith.constant 0 : index
    %c0_8 = arith.constant 0 : index
    %8 = vector.load %arg4[%c0_6, %c0_7, %c0_8] : memref<1x16x128xf32, #tpu.memory_space<vmem>>, vector<1x16x128xf32>
    %9 = vector.shape_cast %8 : vector<1x16x128xf32> to vector<16x128xf32>
    %10 = vector.shape_cast %7 : vector<16x128xf32> to vector<1x16x128xf32>
    tpu.vector_store %arg4[%c0_6, %c0_7, %c0_8], %10 {strides = array<i32>} : memref<1x16x128xf32, #tpu.memory_space<vmem>>, vector<1x16x128xf32>,
    return
  }
  func.func @transform_0(%arg0: i32) -> (i32, i32, i32) {
    %c0_i32 = arith.constant 0 : i32
    %c0_i32_0 = arith.constant 0 : i32
    %c0_i32_1 = arith.constant 0 : i32
    return %arg0, %c0_i32, %c0_i32_0 : i32, i32, i32
  }
  func.func @transform_1(%arg0: i32) -> (i32, i32) {
    %c0_i32 = arith.constant 0 : i32
    %c0_i32_0 = arith.constant 0 : i32
    %c0_i32_1 = arith.constant 0 : i32
    return %c0_i32, %c0_i32_0 : i32, i32
  }
  func.func @transform_2(%arg0: i32) -> (i32, i32) {
    %c0_i32 = arith.constant 0 : i32
    %c0_i32_0 = arith.constant 0 : i32
    %c0_i32_1 = arith.constant 0 : i32
    return %c0_i32, %c0_i32_0 : i32, i32
  }
  func.func @transform_3(%arg0: i32) -> (i32, i32, i32) {
    %c0_i32 = arith.constant 0 : i32
    %c0_i32_0 = arith.constant 0 : i32
    %c0_i32_1 = arith.constant 0 : i32
    return %arg0, %c0_i32, %c0_i32_0 : i32, i32, i32
  }
}

</mosaic_0001>

<bundles_post_ra>
// kernel: tile.13
= control target key start
LH: loop header
LB: loop body
LE: loop exit
PB: predicated region body
PF: predicated region fallthrough
CT: control target
= control target key end

     0   :  { %s28_s0 = inlined_call_operand.vmem [shape: f32[8], index: 0, kind: input, shape index: {}]   ;;  %s29_s1 = inlined_call_operand.vmem [shape: f32[16,8], index: 1, kind: output, shape index: {}]  }
   0x1   :  { %v4_v0 = vld [vmem:[%s28_s0] ss:$0 sm:$0xff] }
   0x2   :  { %5 = vst [vmem:[%s29_s1] sm:$0xff] %v4_v0  ;;  %8 = vst [vmem:[%s29_s1 + $0x8] sm:$0xff] %v4_v0 }

// kernel: tile.14
= control target key start
LH: loop header
LB: loop body
LE: loop exit
PB: predicated region body
PF: predicated region fallthrough
CT: control target
= control target key end

     0   :  { %s131_s10 = smov 120   ;;  %s132_s11 = smov 104   ;;  %vm3_vm0 = vcmask 64512   ;;  %vm9_vm1 = vcmask 1048512   ;;  %vm15_vm2 = vcmask 982912   ;;  %vm21_vm3 = vcmask 917312   ;;  %s207_s0 = inlined_call_operand.vmem [shape: f32[16,8], index: 0, kind: input, shape index: {}]   ;;  %s208_s1 = inlined_call_operand.vmem [shape: f32[1,128], index: 1, kind: output, shape index: {}]  }
   0x1   :  { %v101_v0 = vld [vmem:[%s207_s0 + $0xf] sm:$0x1]   ;;  %v103_v1 = vld [vmem:[%s207_s0 + $0xd] sm:$0x1]   ;;  %v102_v2 = vld [vmem:[%s207_s0 + $0xe] sm:$0x1]  }
   0x2   :  { %7 = vrot.lane.b32.xlu0 %v101_v0, %s131_s10  ;;  %19 = vrot.lane.b32.xlu1 %v103_v1, %s132_s11  ;;  %v104_v3 = vld [vmem:[%s207_s0 + $0xc] sm:$0x1]   ;;  %s133_s16 = smov 112   ;;  %s134_s17 = smov 96   ;;  %v105_v4 = vld [vmem:[%s207_s0 + $0xb] sm:$0x1]  }
   0x3   :  { %v106_v5 = vld [vmem:[%s207_s0 + $0xa] sm:$0x1]   ;;  %v2_v6 = vld [vmem:[%s207_s0] sm:$0x1]   ;;  %s135_s24 = smov 88   ;;  %s136_s25 = smov 80  }
   0x4   :  { %4 = vst.msk [vmem:[#allocation0] sm:$0x1] %vm3_vm0, %v2_v6   ;;  %v107_v7 = vld [vmem:[%s207_s0 + $0x9] sm:$0x1]   ;;  %v108_v8 = vld [vmem:[%s207_s0 + $0x8] sm:$0x1]  }
   0x5   :  { %s137_s30 = smov 72   ;;  %s138_s2 = smov 64   ;;  %v109_v9 = vld [vmem:[%s207_s0 + $0x7] sm:$0x1]   ;;  %v110_v10 = vld [vmem:[%s207_s0 + $0x6] sm:$0x1]  }
   0x6   :  { %13 = vrot.lane.b32.xlu0 %v102_v2, %s133_s16  ;;  %25 = vrot.lane.b32.xlu1 %v104_v3, %s134_s17  ;;  %s139_s7 = smov 56   ;;  %s140_s8 = smov 48   ;;  %v111_v11 = vld [vmem:[%s207_s0 + $0x5] sm:$0x1]   ;;  %v112_v12 = vld [vmem:[%s207_s0 + $0x4] sm:$0x1]  }
   0x7   :  { %s141_s13 = smov 40   ;;  %s142_s14 = smov 32   ;;  %v113_v13 = vld [vmem:[%s207_s0 + $0x3] sm:$0x1]   ;;  %v114_v14 = vld [vmem:[%s207_s0 + $0x2] sm:$0x1]  }
   0x8   :  { %s143_s19 = smov 24   ;;  %s144_s20 = smov 16   ;;  %v115_v15 = vld [vmem:[%s207_s0 + $0x1] sm:$0x1]   ;;  %vm27_vm4 = vcmask 851712   ;;  %vm33_vm5 = vcmask 786112  }
   0x9   :  { %s145_s0 = smov 8   ;;  %vm39_vm6 = vcmask 720512   ;;  %vm45_vm7 = vcmask 654912   ;;  %vm51_vm8 = vcmask 589312   ;;  %vm57_vm9 = vcmask 523712  }
   0xa   :  { %31 = vrot.lane.b32.xlu0 %v105_v4, %s135_s24  ;;  %37 = vrot.lane.b32.xlu1 %v106_v5, %s136_s25  ;;  %vm63_vm10 = vcmask 458112   ;;  %vm69_vm11 = vcmask 392512   ;;  %vm75_vm12 = vcmask 326912   ;;  %vm81_vm13 = vcmask 261312  }
   0xb   :  { %vm87_vm14 = vcmask 195712   ;;  %vm93_vm15 = vcmask 130112  }
   0xe   :  { %43 = vrot.lane.b32.xlu0 %v107_v7, %s137_s30  ;;  %49 = vrot.lane.b32.xlu1 %v108_v8, %s138_s2 }
  0x12   :  { %55 = vrot.lane.b32.xlu0 %v109_v9, %s139_s7  ;;  %61 = vrot.lane.b32.xlu1 %v110_v10, %s140_s8 }
  0x16   :  { %67 = vrot.lane.b32.xlu0 %v111_v11, %s141_s13  ;;  %73 = vrot.lane.b32.xlu1 %v112_v12, %s142_s14 }
  0x1a   :  { %79 = vrot.lane.b32.xlu0 %v113_v13, %s143_s19  ;;  %85 = vrot.lane.b32.xlu1 %v114_v14, %s144_s20 }
  0x1e   :  { %91 = vrot.lane.b32.xlu0 %v115_v15, %s145_s0 }
  0x74   :  { %v8_v16 = vpop.permute.xlu0 %7   ;;  %v20_v17 = vpop.permute.xlu1 %19  }
  0x75   :  { %10 = vst.msk [vmem:[#allocation0] sm:$0x1] %vm9_vm1, %v8_v16  }
  0x78   :  { %v14_v18 = vpop.permute.xlu0 %13   ;;  %v26_v19 = vpop.permute.xlu1 %25  }
  0x79   :  { %16 = vst.msk [vmem:[#allocation0] sm:$0x1] %vm15_vm2, %v14_v18  }
  0x7a   :  { %22 = vst.msk [vmem:[#allocation0] sm:$0x1] %vm21_vm3, %v20_v17  }
  0x7b   :  { %28 = vst.msk [vmem:[#allocation0] sm:$0x1] %vm27_vm4, %v26_v19  }
  0x7c   :  { %v32_v20 = vpop.permute.xlu0 %31   ;;  %v38_v21 = vpop.permute.xlu1 %37  }
  0x7d   :  { %34 = vst.msk [vmem:[#allocation0] sm:$0x1] %vm33_vm5, %v32_v20  }
  0x7e   :  { %40 = vst.msk [vmem:[#allocation0] sm:$0x1] %vm39_vm6, %v38_v21  }
  0x80   :  { %v44_v22 = vpop.permute.xlu0 %43   ;;  %v50_v23 = vpop.permute.xlu1 %49  }
  0x81   :  { %46 = vst.msk [vmem:[#allocation0] sm:$0x1] %vm45_vm7, %v44_v22  }
  0x82   :  { %52 = vst.msk [vmem:[#allocation0] sm:$0x1] %vm51_vm8, %v50_v23  }
  0x84   :  { %v56_v24 = vpop.permute.xlu0 %55   ;;  %v62_v25 = vpop.permute.xlu1 %61  }
  0x85   :  { %58 = vst.msk [vmem:[#allocation0] sm:$0x1] %vm57_vm9, %v56_v24  }
  0x86   :  { %64 = vst.msk [vmem:[#allocation0] sm:$0x1] %vm63_vm10, %v62_v25  }
  0x88   :  { %v68_v26 = vpop.permute.xlu0 %67   ;;  %v74_v27 = vpop.permute.xlu1 %73  }
  0x89   :  { %70 = vst.msk [vmem:[#allocation0] sm:$0x1] %vm69_vm11, %v68_v26  }
  0x8a   :  { %76 = vst.msk [vmem:[#allocation0] sm:$0x1] %vm75_vm12, %v74_v27  }
  0x8c   :  { %v80_v28 = vpop.permute.xlu0 %79   ;;  %v86_v29 = vpop.permute.xlu1 %85  }
  0x8d   :  { %82 = vst.msk [vmem:[#allocation0] sm:$0x1] %vm81_vm13, %v80_v28  }
  0x8e   :  { %88 = vst.msk [vmem:[#allocation0] sm:$0x1] %vm87_vm14, %v86_v29  }
  0x90   :  { %v92_v30 = vpop.permute.xlu0 %91  }
  0x91   :  { %94 = vst.msk [vmem:[#allocation0] sm:$0x1] %vm93_vm15, %v92_v30  }
  0x98   :  { %v98_v31 = vld [vmem:[#allocation0] sm:$0x1] }
  0x99   :  { %100 = vst [vmem:[%s208_s1] sm:$0x1] %v98_v31 }

// kernel: _conv_bn2d_impl.2
= control target key start
LH: loop header
LB: loop body
LE: loop exit
PB: predicated region body
PF: predicated region fallthrough
CT: control target
= control target key end

     0   :  { %s752_s12 = smov 0   ;;  %s855_s0 = inlined_call_operand.vmem [shape: bf16[2,18,72], index: 0, kind: input, shape index: {}]   ;;  %s856_s1 = inlined_call_operand.vmem [shape: bf16[3,72,128], index: 1, kind: input, shape index: {}]   ;;  %s857_s2 = inlined_call_operand.vmem [shape: f32[2,16,128], index: 2, kind: output, shape index: {0}]   ;;  %s858_s3 = inlined_call_operand.vmem [shape: f32[2,2,128], index: 3, kind: output, shape index: {1}]  }
   0x1 LB: > { %s576_s13 = sadd.s32 4294967295, %s728_s12   ;;  %p580_p0 = scmp.ge.s32.totalorder %s728_s12, 1  ;;  %s728_s12 = sphi %s752_s12, %s14_s12  }
   0x2   : > { %p140_p1 = scmp.lt.s32.totalorder %s728_s12, 3 }
   0x4   : > { %p141_p2 = pnand %p580_p0, %p140_p1 }
   0x5   : > { %v704_v0 = vld [vmem:[%s856_s1] sm:$0xff] (!%p141_p2)   ;;  %v730_v1 = vmov (!%p141_p2), 0.0   ;;  %v705_v2 = vld [vmem:[%s856_s1 + $0x8] sm:$0xff] (!%p141_p2)   ;;  %vm731_vm0 = vmmov (!%p141_p2), 0   ;;  %p168_p3 = scmp.lt.s32.totalorder (!%p141_p2), %s576_s13, 1  ;;  %v706_v4 = vld [vmem:[%s856_s1 + $0x10] sm:$0xff] (!%p141_p2)  }
   0x6   : > { %144 = sbr.rel (%p141_p2) target bundleno = 280 (0x118), region = 28  ;;  %659 = vmatprep.subr.bf16.mxu0 (!%p141_p2), %v730_v1  ;;  %645 = vmatprep.subr.bf16.mxu1 (!%p141_p2), %v730_v1  ;;  %v709_v3 = vld [vmem:[%s856_s1 + $0x24] sm:$0xff] (!%p141_p2)   ;;  %v713_v5 = vld [vmem:[%s856_s1 + $0x2c] sm:$0xff] (!%p141_p2)   ;;  %v707_v6 = vld [vmem:[%s856_s1 + $0x18] sm:$0xff] (!%p141_p2)   ;;  %vm257_vm1 = vcmask (!%p141_p2), 1043456   ;;  %vm253_vm2 = vcmask (!%p141_p2), 588800  }
   0x7   : > { %660 = vmatpush3.bf16.msra.mxu0 (!%p141_p2), %v704_v0  ;;  %669 = vmatprep.mubr.msk.bf16.mxu0 (!%p141_p2), %vm731_vm0, %v730_v1  ;;  %v708_v7 = vld [vmem:[%s856_s1 + $0x20] ss:$0 sps:$4 sm:$0xff] (!%p141_p2)   ;;  %v715_v10 = vld [vmem:[%s856_s1 + $0x34] sm:$0xff] (!%p141_p2)   ;;  %v719_v17 = vld [vmem:[%s856_s1 + $0x44] ss:$0 sps:$4 sm:$0xff] (!%p141_p2)   ;;  %vm389_vm4 = vcmask (!%p141_p2), 1046528  }
   0x8   : > { %661 = vmatprep.subr.bf16.mxu0 (!%p141_p2), %v730_v1  ;;  %655 = vmatprep.mubr.msk.bf16.mxu1 (!%p141_p2), %vm731_vm0, %v730_v1  ;;  %v332_v12 = vsel (!%p141_p2), %vm257_vm1, %v708_v7, 0  ;;  %v717_v13 = vld [vmem:[%s856_s1 + $0x3c] sm:$0xff] (!%p141_p2)   ;;  %v712_v20 = vld [vmem:[%s856_s1 + $0x48] sm:$0xff] (!%p141_p2)   ;;  %v259_v23 = vsel (!%p141_p2), %vm257_vm1, %v719_v17, 0  ;;  %vm213_vm3 = vsmask.f32 (!%p141_p2), 7424 }
   0x9   : > { %646 = vmatpush3.bf16.msra.mxu1 (!%p141_p2), %v709_v3  ;;  %v714_v24 = vld [vmem:[%s856_s1 + $0x50] sm:$0xff] (!%p141_p2)   ;;  %v716_v26 = vld [vmem:[%s856_s1 + $0x58] sm:$0xff] (!%p141_p2)   ;;  %v718_v29 = vld [vmem:[%s856_s1 + $0x60] sm:$0xff] (!%p141_p2)   ;;  %vm487_vm5 = vcmask (!%p141_p2), 1040384  }
   0xa   : > { %647 = vmatprep.subr.bf16.mxu1 (!%p141_p2), %v730_v1  ;;  %v721_v30 = vld [vmem:[%s856_s1 + $0x68] ss:$0 sps:$4 sm:$0xff] (!%p141_p2)  }
   0xb   : > { %662 = vmatpush3.bf16.msra.mxu0 (!%p141_p2), %v705_v2  ;;  %v424_v33 = vsel (!%p141_p2), %vm257_vm1, %v721_v30, 0 }
   0xc   : > { %663 = vmatprep.subr.bf16.mxu0 (!%p141_p2), %v730_v1 }
   0xd   : > { %s860_s13 = smov (!%p168_p3, %s576_s13), 1  ;;  %648 = vmatpush3.bf16.msra.mxu1 %v713_v5 }
   0xe   : > { %s693_s22 = smul.u32 12, %s860_s13  ;;  %649 = vmatprep.subr.bf16.mxu1 %v730_v1  ;;  %s626_s23 = sshll.u32 %s860_s13, 4 }
   0xf   : > { %664 = vmatpush3.bf16.msra.mxu0 %v706_v4  ;;  %s177_s26 = scalar_lea.vmem %s857_s2, %s626_s23  ;;  %s584_s27 = sshll.u32 %s860_s13, 1 }
  0x10   : > { %s793_s29 = scalar_lea.vmem %s855_s0, %s693_s22  ;;  %665 = vmatprep.subr.bf16.mxu0 %v730_v1  ;;  %s181_s30 = scalar_lea.vmem %s858_s3, %s584_s27 }
  0x11   : > { %v183_v8 = vld [vmem:[%s793_s29] sm:$0xf]  ;;  %v184_v9 = vld [vmem:[%s793_s29 + $0x4] sm:$0xf]  ;;  %650 = vmatpush3.bf16.msra.mxu1 %v715_v10 }
  0x12   : > { %v594_v11 = vcombine.low %v183_v8, %v184_v9  ;;  %v720_v14 = vld [vmem:[%s793_s29 + $0x8] ss:$0 sps:$4 sm:$0x11]   ;;  %651 = vmatprep.subr.bf16.mxu1 %v730_v1  ;;  %v375_v27 = vld [vmem:[%s793_s29] sm:$0xe] }
  0x13   : > { %666 = vmatpush3.bf16.msra.mxu0 %v707_v6  ;;  %v222_v19 = vshll.u32 %v720_v14, 16  ;;  %v617_v28 = vcombine.low %v375_v27, %v184_v9  ;;  %v391_v32 = vrot.slane %v720_v14, 1 }
  0x14   : > { %667 = vmatprep.subr.bf16.mxu0 %v730_v1  ;;  %v215_v15 = vshrl.u32 %v594_v11, 16  ;;  %v217_v16 = vshll.u32 %v594_v11, 16 }
  0x15   : > { %652 = vmatpush3.bf16.msra.mxu1 %v717_v13  ;;  %v224_v22 = vrot.slane %v222_v19, 1  ;;  %v390_v31 = vrot.slane %v617_v28, 1 }
  0x16   : > { %v219_v18 = vrot.slane %v217_v16, 1  ;;  %653 = vmatprep.subr.bf16.mxu1 %v730_v1 }
  0x17   : > { %668 = vmatpush3.bf16.msra.mxu0 %v332_v12  ;;  %v392_v34 = vsel %vm389_vm4, %v390_v31, %v391_v32 }
  0x18   : > { %673 = vmatprep.subr.bf16.mxu0 %v730_v1  ;;  %v220_v21 = vor.u32 %v219_v18, %v215_v15 }
  0x19   : > { %654 = vmatpush3.bf16.msra.mxu1 %v259_v23 }
  0x1a   : > { %670 = vmatmul.mubr.msk.bf16.vlgmr.msra.gmra.mrb[0].mxu0 %vm253_vm2, %v594_v11  ;;  %v225_v25 = vsel %vm213_vm3, %v220_v21, %v224_v22 }
  0x1b   : > { %674 = vmatpush3.bf16.msra.mxu0 %v712_v20  ;;  %683 = vmatprep.mubr.msk.bf16.mxu0 %vm731_vm0, %v730_v1 }
  0x1c   : > { %675 = vmatprep.subr.bf16.mxu0 %v730_v1  ;;  %656 = vmatmul.mubr.msk.bf16.vlgmr.msra.gmra.mrb[0].mxu1 %vm253_vm2, %v225_v25 }
  0x1f   : > { %676 = vmatpush3.bf16.msra.mxu0 %v714_v24 }
  0x20   : > { %677 = vmatprep.subr.bf16.mxu0 %v730_v1 }
  0x23   : > { %678 = vmatpush3.bf16.msra.mxu0 %v716_v26 }
  0x24   : > { %679 = vmatprep.subr.bf16.mxu0 %v730_v1 }
  0x27   : > { %680 = vmatpush3.bf16.msra.mxu0 %v718_v29 }
  0x28   : > { %681 = vmatprep.subr.bf16.mxu0 %v730_v1 }
  0x2b   : > { %682 = vmatpush3.bf16.msra.mxu0 %v424_v33 }
  0x2e   : > { %684 = vmatmul.mubr.msk.bf16.vlgmr.msra.gmra.mrb[0].mxu0 %vm253_vm2, %v392_v34 }
  0xef   : > { %v295_v35 = vpop.f32.mrb[0].mxu1 }
  0xf0   : > { %v657_v36 = vpop.f32.mrb[1].mxu1 }
  0xf1   : > { %v298_v37 = vpop.f32.mrb[2].mxu1 }
  0xf2   : > { %v658_v38 = vpop.f32.mrb[3].mxu1 }
 0x101   : > { %v460_v39 = vpop.f32.mrb[0].mxu0 }
 0x102   : > { %v687_v40 = vadd.f32 %v460_v39, %v295_v35  ;;  %v685_v41 = vpop.f32.mrb[1].mxu0 }
 0x103   : > { %v463_v42 = vpop.f32.mrb[2].mxu0 }
 0x104   : > { %469 = vst [vmem:[%s177_s26] sm:$0xff] %v687_v40  ;;  %v688_v43 = vadd.f32 %v463_v42, %v298_v37  ;;  %v686_v44 = vpop.f32.mrb[3].mxu0  ;;  %v478_v45 = vmul.f32 %v687_v40, %v687_v40 }
 0x106   : > { %470 = vst [vmem:[%s177_s26 + $0x8] sm:$0xff] %v688_v43  ;;  %v471_v46 = vadd.f32 %v688_v43, %v687_v40  ;;  %v479_v47 = vmul.f32 %v688_v43, %v688_v43 }
 0x108   : > { %v472_v48 = vrot.slane %v471_v46, 4  ;;  %v480_v49 = vadd.f32 %v479_v47, %v478_v45 }
 0x10a   : > { %v473_v50 = vadd.f32 %v472_v48, %v471_v46  ;;  %v481_v51 = vrot.slane %v480_v49, 4 }
 0x10c   : > { %v474_v52 = vrot.slane %v473_v50, 2  ;;  %v482_v53 = vadd.f32 %v481_v51, %v480_v49 }
 0x10e   : > { %v475_v54 = vadd.f32 %v474_v52, %v473_v50  ;;  %v483_v55 = vrot.slane %v482_v53, 2 }
 0x110   : > { %v476_v56 = vrot.slane %v475_v54, 1  ;;  %v484_v57 = vadd.f32 %v483_v55, %v482_v53 }
 0x112   : > { %v485_v58 = vrot.slane %v484_v57, 1  ;;  %v477_v59 = vadd.f32 %v476_v56, %v475_v54 }
 0x114   : > { %v486_v60 = vadd.f32 %v485_v58, %v484_v57 }
 0x116   : > { %v488_v61 = vsel %vm487_vm5, %v477_v59, %v486_v60 }
 0x117   : > { %489 = vst [vmem:[%s181_s30] sm:$0x3] %v488_v61 }
 0x118 PF: > { %s14_s12 = sadd.s32 1, %s728_s12  }
 0x119   : > { %p11_p4 = scmp.ge.s32.totalorder %s14_s12, 4  }
 0x11b   :  { %13 = sbr.rel (!%p11_p4) target bundleno = 1 (0x1), region = 72 }

// kernel: _conv_bn2d_impl.3
= control target key start
LH: loop header
LB: loop body
LE: loop exit
PB: predicated region body
PF: predicated region fallthrough
CT: control target
= control target key end

     0   :  { %s275_s12 = smov 0   ;;  %s311_s0 = inlined_call_operand.vmem [shape: f32[2,16,128], index: 0, kind: input, shape index: {}]   ;;  %s312_s1 = inlined_call_operand.vmem [shape: f32[1,128], index: 1, kind: input, shape index: {}]   ;;  %s313_s2 = inlined_call_operand.vmem [shape: f32[1,128], index: 2, kind: input, shape index: {}]   ;;  %s314_s3 = inlined_call_operand.vmem [shape: f32[2,16,128], index: 3, kind: output, shape index: {}]  }
   0x1 LB: > { %s248_s13 = sadd.s32 4294967295, %s277_s12   ;;  %p252_p0 = scmp.ge.s32.totalorder %s277_s12, 1  ;;  %s277_s12 = sphi %s275_s12, %s13_s12  }
   0x2   : > { %p137_p1 = scmp.lt.s32.totalorder %s277_s12, 3 }
   0x4   : > { %p138_p2 = pnand %p252_p0, %p137_p1 }
   0x5   : > { %p161_p3 = scmp.lt.s32.totalorder (!%p138_p2), %s248_s13, 1  ;;  %v257_v0 = vld [vmem:[%s312_s1] ss:$0 sm:$0xff] (!%p138_p2) }
   0x6   : > { %141 = sbr.rel (%p138_p2) target bundleno = 22 (0x16), region = 32  ;;  %v258_v3 = vld [vmem:[%s313_s2] ss:$0 sm:$0xff] (!%p138_p2) }
   0xd   : > { %s316_s13 = smov (!%p161_p3, %s248_s13), 1 }
   0xe   : > { %s261_s14 = sshll.u32 %s316_s13, 4 }
   0xf   : > { %s165_s19 = scalar_lea.vmem %s311_s0, %s261_s14  ;;  %s170_s24 = scalar_lea.vmem %s314_s3, %s261_s14 }
  0x10   : > { %v171_v1 = vld [vmem:[%s165_s19] sm:$0xff]  ;;  %v172_v2 = vld [vmem:[%s165_s19 + $0x8] sm:$0xff] }
  0x11   : > { %v180_v4 = vmul.f32 %v257_v0, %v171_v1  ;;  %v181_v5 = vmul.f32 %v257_v0, %v172_v2 }
  0x13   : > { %v189_v6 = vadd.f32 %v258_v3, %v180_v4  ;;  %v190_v7 = vadd.f32 %v258_v3, %v181_v5 }
  0x15   : > { %191 = vst [vmem:[%s170_s24] sm:$0xff] %v189_v6  ;;  %192 = vst [vmem:[%s170_s24 + $0x8] sm:$0xff] %v190_v7 }
  0x16 PF: > { %s13_s12 = sadd.s32 1, %s277_s12  }
  0x17   : > { %p10_p4 = scmp.ge.s32.totalorder %s13_s12, 4  }
  0x19   :  { %12 = sbr.rel (!%p10_p4) target bundleno = 1 (0x1), region = 62 }

</bundles_post_ra>
